<compile_context>
chip_gen: v7x
topology: tpu7x:2x2x1
jax: 0.10.0
libtpu: 0.0.40
codegen_flags: <defaults>
</compile_context>

<pallas_src>
import functools

import jax
import jax.numpy as jnp
from jax import lax
from jax.experimental import pallas as pl
from jax.experimental.pallas import tpu as pltpu

_LANE_PAD = 128  # lane padding that carries the dustbin column


def _log_sigmoid(x):
    # log(sigmoid(x)) = -log(1 + exp(-x)) = -logaddexp(0, -x)
    return -jnp.logaddexp(0.0, -x)


def _tpu_vmem_capacity_bytes():
    try:
        info = pltpu.get_tpu_info()
        for attr in ("vmem_capacity_bytes", "vmem_bytes", "vmem_size_bytes"):
            v = getattr(info, attr, None)
            if v:
                return int(v)
    except Exception:
        pass
    return 64 * 2 ** 20  # conservative (v7x-sized) fallback


def _vmem_estimate(tm, n, d, csz, sim_sz):
    # Double-buffered inputs/outputs of both passes + f32 temporaries.
    ins = 2 * (tm * d * csz + n * d * csz + d * d * csz + d * 4)
    outs = 2 * (tm * n * sim_sz + tm * 4 + n * 4 + tm * (n + _LANE_PAD) * 4)
    tmps = 4 * tm * n * 4
    return ins + outs + tmps + (1 << 20)


def _pick_tile_m(m, n, d, csz, sim_sz, vmem_cap):
    """Largest M tile whose per-step working set fits ~half of this chip's VMEM."""
    budget = int(0.45 * vmem_cap)
    cands = [c for c in (1024, 512, 256, 128, 64, 32, 16, 8) if c <= m and m % c == 0]
    if not cands:
        # TODO(synk): pad ragged M up to a multiple of 8 (-inf masking of pad rows
        # before the softmaxes) instead of falling back to a single full-M tile.
        return m
    for tm in cands:
        if _vmem_estimate(tm, n, d, csz, sim_sz) <= budget:
            return tm
    return cands[-1]


def _sim_stats_kernel(d0_ref, md1_ref, w_ref, b_ref,
                      sim_ref, lse_row_ref, col_part_ref, *, exact_col_lse):
    """Pass 1: sim tile + row LSE + per-tile column-LSE partials (one exp pass)."""
    cdt = w_ref.dtype
    # Fused projection of the desc0 tile (dim**-0.25 folded into w/b) on the MXU.
    md0 = jnp.dot(d0_ref[...].astype(cdt), w_ref[...],
                  preferred_element_type=jnp.float32) + b_ref[...]       # (TM, D) f32
    # sim = md0 @ md1^T without materializing a transpose (contract last dims).
    sim = lax.dot_general(md0.astype(cdt), md1_ref[...],
                          (((1,), (1,)), ((), ())),
                          preferred_element_type=jnp.float32)            # (TM, N) f32

    row_max = jnp.max(sim, axis=1, keepdims=True)                        # (TM, 1)
    e = jnp.exp(sim - row_max)                                           # single EUP pass
    lse_row_ref[...] = row_max + jnp.log(jnp.sum(e, axis=1, keepdims=True))

    if exact_col_lse:
        # Per-column max (second exp pass) — numerically safest variant.
        col_max = jnp.max(sim, axis=0, keepdims=True)                    # (1, N)
        col_sum = jnp.sum(jnp.exp(sim - col_max), axis=0, keepdims=True)
        col_part_ref[...] = col_max + jnp.log(col_sum)
    else:
        # Reuse E: sum_i exp(sim_ij - c) = sum_i E_ij * exp(row_max_i - c),
        # c = per-tile scalar max (exponents <= 0, no overflow).
        c = jnp.max(row_max, axis=0, keepdims=True)                      # (1, 1)
        col_sum = jnp.sum(e * jnp.exp(row_max - c), axis=0, keepdims=True)
        col_part_ref[...] = c + jnp.log(col_sum)                         # (1, N)

    sim_ref[...] = sim.astype(sim_ref.dtype)


def _assemble_kernel(sim_ref, lse_row_ref, lse_col_ref, z0_ref, z1_ref, top_ref):
    """Pass 2: interior = 2*sim - lse_row - lse_col + logsig(z0) + logsig(z1),
    plus the dustbin column, written lane-dense into a 128-lane padded buffer."""
    tm, n = sim_ref.shape
    sim = sim_ref[...].astype(jnp.float32)
    z0 = z0_ref[...]                                                     # (TM, 1)
    z1 = z1_ref[...]                                                     # (1, N)
    row_term = _log_sigmoid(z0) - lse_row_ref[...]                       # (TM, 1)
    col_term = _log_sigmoid(z1) - lse_col_ref[...]                       # (1, N)
    top_ref[:, :n] = 2.0 * sim + row_term + col_term
    top_ref[:, n:] = jnp.broadcast_to(_log_sigmoid(-z0),
                                      (tm, top_ref.shape[1] - n))        # dustbin col


def match_assignment(desc0, desc1, wp, bp, wm_w, bm, *,
                     mxu_dtype=None, sim_dtype=jnp.float32, exact_col_lse=False):
    """desc0: (B, M, D), desc1: (B, N, D).
    wp: (D, D) final_proj.weight (out, in), bp: (D,) final_proj.bias,
    wm_w: (1, D) matchability.weight, bm: (1,) matchability.bias.
    mxu_dtype: dtype fed to the MXU (e.g. jnp.bfloat16 for speed); default = desc dtype.
    Returns (scores (B, M+1, N+1) f32, sim (B, M, N) sim_dtype)."""
    f32 = jnp.float32
    b, m, d = desc0.shape
    b1, n, d1 = desc1.shape
    assert b1 == b and d1 == d and wp.shape == (d, d)
    cdt = jnp.dtype(mxu_dtype) if mxu_dtype is not None else jnp.dtype(desc0.dtype)
    scale = float(d) ** (-0.25)

    # dim**-0.25 folded into the pre-transposed projection weight / bias.
    wpt = (wp.astype(f32).T * scale).astype(cdt)                         # (D, D)
    bps = (bp.astype(f32) * scale).reshape(1, d)                         # (1, D) f32

    # Project desc1 once (would otherwise be redone for every M tile).
    md1 = (jnp.einsum("bnd,dk->bnk", desc1.astype(cdt), wpt,
                      preferred_element_type=f32, precision="highest")
           + bps).astype(cdt)                                            # (B, N, D)

    # Matchability logits (tiny: O((M+N)*D)).
    wmv = wm_w.astype(f32).reshape(d)
    bmv = jnp.asarray(bm, f32).reshape(())
    z0 = (jnp.einsum("bmd,d->bm", desc0.astype(f32), wmv,
                     precision="highest") + bmv)[..., None]              # (B, M, 1)
    z1 = (jnp.einsum("bnd,d->bn", desc1.astype(f32), wmv,
                     precision="highest") + bmv)[:, None, :]             # (B, 1, N)

    # Generation-aware tiling + scoped-VMEM limit (v7x: 64 MiB, v5e/v6e: 128 MiB).
    vmem_cap = _tpu_vmem_capacity_bytes()
    tm = _pick_tile_m(m, n, d, jnp.dtype(cdt).itemsize,
                      jnp.dtype(sim_dtype).itemsize, vmem_cap)
    t = m // tm
    grid = (b, t)
    cparams = pltpu.CompilerParams(
        dimension_semantics=("parallel", "parallel"),
        vmem_limit_bytes=int(min(0.8 * vmem_cap, 112 * 2 ** 20)))

    # ---- Pass 1: sim tiles + row LSE + per-tile column-LSE partials ----------
    sim, lse_row, col_part = pl.pallas_call(
        functools.partial(_sim_stats_kernel, exact_col_lse=exact_col_lse),
        out_shape=(
            jax.ShapeDtypeStruct((b, m, n), sim_dtype),
            jax.ShapeDtypeStruct((b, m, 1), f32),
            jax.ShapeDtypeStruct((b, t, 1, n), f32),
        ),
        grid=grid,
        in_specs=[
            pl.BlockSpec((pl.Squeezed(), tm, d), lambda bi, mi: (bi, mi, 0)),
            pl.BlockSpec((pl.Squeezed(), n, d), lambda bi, mi: (bi, 0, 0)),
            pl.BlockSpec((d, d), lambda bi, mi: (0, 0)),
            pl.BlockSpec((1, d), lambda bi, mi: (0, 0)),
        ],
        out_specs=(
            pl.BlockSpec((pl.Squeezed(), tm, n), lambda bi, mi: (bi, mi, 0)),
            pl.BlockSpec((pl.Squeezed(), tm, 1), lambda bi, mi: (bi, mi, 0)),
            pl.BlockSpec((pl.Squeezed(), pl.Squeezed(), 1, n),
                         lambda bi, mi: (bi, mi, 0, 0)),
        ),
        compiler_params=cparams,
    )(desc0, md1, wpt, bps)

    # ---- Combine per-tile column partials (tiny O(B*T*N) logsumexp in XLA) ----
    cp = col_part[:, :, 0, :]                                            # (B, T, N)
    pm = jnp.max(cp, axis=1)
    pm_safe = jnp.where(jnp.isfinite(pm), pm, 0.0)
    lse_col = pm_safe + jnp.log(jnp.sum(jnp.exp(cp - pm_safe[:, None, :]), axis=1))
    lse_col = jnp.where(jnp.isfinite(pm), lse_col, -jnp.inf)[:, None, :]  # (B, 1, N)

    # ---- Pass 2: interior + dustbin column, lane-dense, no MXU redo ----------
    scores_top = pl.pallas_call(
        _assemble_kernel,
        out_shape=jax.ShapeDtypeStruct((b, m, n + _LANE_PAD), f32),
        grid=grid,
        in_specs=[
            pl.BlockSpec((pl.Squeezed(), tm, n), lambda bi, mi: (bi, mi, 0)),
            pl.BlockSpec((pl.Squeezed(), tm, 1), lambda bi, mi: (bi, mi, 0)),
            pl.BlockSpec((pl.Squeezed(), 1, n), lambda bi, mi: (bi, 0, 0)),
            pl.BlockSpec((pl.Squeezed(), tm, 1), lambda bi, mi: (bi, mi, 0)),
            pl.BlockSpec((pl.Squeezed(), 1, n), lambda bi, mi: (bi, 0, 0)),
        ],
        out_specs=pl.BlockSpec((pl.Squeezed(), tm, n + _LANE_PAD),
                               lambda bi, mi: (bi, mi, 0)),
        compiler_params=cparams,
    )(sim, lse_row, lse_col, z0, z1)

    # ---- Final (B, M+1, N+1) assembly: one slice + a 1-row concat. -----------
    # Consumers that can take the padded layout should use scores_top directly.
    dust_row = _log_sigmoid(-z1)                                         # (B, 1, N)
    bot = jnp.concatenate([dust_row, jnp.zeros((b, 1, 1), f32)], axis=2)
    scores = jnp.concatenate([scores_top[:, :, : n + 1], bot], axis=1)
    return scores, sim


def match_assignment_reference(desc0, desc1, wp, bp, wm_w, bm):
    """Pure-JAX reference replicating the PyTorch forward exactly."""
    f32 = jnp.float32
    d = desc0.shape[-1]
    md0 = jnp.einsum("bmd,kd->bmk", desc0.astype(f32), wp.astype(f32),
                     precision="highest") + bp.astype(f32)
    md1 = jnp.einsum("bnd,kd->bnk", desc1.astype(f32), wp.astype(f32),
                     precision="highest") + bp.astype(f32)
    md0 = md0 / d ** 0.25
    md1 = md1 / d ** 0.25
    sim = jnp.einsum("bmd,bnd->bmn", md0, md1, precision="highest")
    z0 = jnp.einsum("bmd,kd->bmk", desc0.astype(f32), wm_w.astype(f32),
                    precision="highest") + bm.astype(f32)                # (B, M, 1)
    z1 = jnp.einsum("bnd,kd->bnk", desc1.astype(f32), wm_w.astype(f32),
                    precision="highest") + bm.astype(f32)                # (B, N, 1)
    cert = jax.nn.log_sigmoid(z0) + jnp.swapaxes(jax.nn.log_sigmoid(z1), 1, 2)
    s0 = jax.nn.log_softmax(sim, axis=2)
    s1 = jnp.swapaxes(jax.nn.log_softmax(jnp.swapaxes(sim, 1, 2), axis=2), 1, 2)
    b_, m_, n_ = sim.shape
    scores = jnp.zeros((b_, m_ + 1, n_ + 1), f32)
    scores = scores.at[:, :m_, :n_].set(s0 + s1 + cert)
    scores = scores.at[:, :-1, -1].set(jax.nn.log_sigmoid(-z0[..., 0]))
    scores = scores.at[:, -1, :-1].set(jax.nn.log_sigmoid(-z1[..., 0]))
    return scores, sim


if __name__ == "__main__":
    B, M, N, D = 2, 16, 8, 32

    key = jax.random.PRNGKey(0)
    k0, k1, k2, k3, k4, k5 = jax.random.split(key, 6)

    desc0 = jax.random.normal(k0, (B, M, D), jnp.float32)
    desc1 = jax.random.normal(k1, (B, N, D), jnp.float32)

    # Deterministic synthetic parameters (shapes from nn.Linear in __init__).
    wp = jax.random.normal(k2, (D, D), jnp.float32) / jnp.sqrt(D)    # final_proj.weight
    bp = jax.random.normal(k3, (D,), jnp.float32) * 0.1              # final_proj.bias
    wm_w = jax.random.normal(k4, (1, D), jnp.float32) / jnp.sqrt(D)  # matchability.weight
    bm = jax.random.normal(k5, (1,), jnp.float32) * 0.1              # matchability.bias

    run = jax.jit(match_assignment)
    scores, sim = run(desc0, desc1, wp, bp, wm_w, bm)
    jax.block_until_ready((scores, sim))

    scores_ref, sim_ref = match_assignment_reference(desc0, desc1, wp, bp, wm_w, bm)

    assert scores.shape == (B, M + 1, N + 1) and sim.shape == (B, M, N)
    # f32 path: tolerance covers MXU default-precision vs XLA reference drift.
    assert jnp.allclose(sim, sim_ref, rtol=2e-2, atol=5e-2), \
        float(jnp.max(jnp.abs(sim - sim_ref)))
    assert jnp.allclose(scores, scores_ref, rtol=2e-2, atol=5e-2), \
        float(jnp.max(jnp.abs(scores - scores_ref)))

    # Exercise the bf16-MXU fast path (weights/operands quantized -> loose check).
    run_bf16 = jax.jit(functools.partial(match_assignment, mxu_dtype=jnp.bfloat16))
    scores_b, sim_b = run_bf16(desc0, desc1, wp, bp, wm_w, bm)
    jax.block_until_ready((scores_b, sim_b))
    assert bool(jnp.all(jnp.isfinite(scores_b)))
    assert float(jnp.max(jnp.abs(scores_b - scores_ref))) < 0.5

    print("KERNEL_OK")
</pallas_src>

<mosaic_0001>
module attributes {stable_mosaic.version = 11 : i64} {
  func.func @_sim_stats_kernel(%arg0: i32, %arg1: i32, %arg2: memref<1x16x32xf32, #tpu.memory_space<vmem>>, %arg3: memref<1x8x32xf32, #tpu.memory_space<vmem>>, %arg4: memref<32x32xf32, #tpu.memory_space<vmem>>, %arg5: memref<1x32xf32, #tpu.memory_space<vmem>>, %arg6: memref<1x16x8xf32, #tpu.memory_space<vmem>>, %arg7: memref<1x16x1xf32, #tpu.memory_space<vmem>>, %arg8: memref<1x1x1x8xf32, #tpu.memory_space<vmem>>) attributes {dimension_semantics = [#tpu.dimension_semantics<parallel>, #tpu.dimension_semantics<parallel>], iteration_bounds = array<i64: 2, 1>, scalar_prefetch = 0 : i64, scratch_operands = 0 : i64, tpu.core_type = #tpu.core_type<tc>, window_params = [{transform_indices = @transform_0, window_bounds = array<i64: 1, 16, 32>}, {transform_indices = @transform_1, window_bounds = array<i64: 1, 8, 32>}, {pipeline_mode = #tpu.pipeline_mode<synchronous>, transform_indices = @transform_2, window_bounds = array<i64: 32, 32>}, {pipeline_mode = #tpu.pipeline_mode<synchronous>, transform_indices = @transform_3, window_bounds = array<i64: 1, 32>}, {transform_indices = @transform_4, window_bounds = array<i64: 1, 16, 8>}, {transform_indices = @transform_5, window_bounds = array<i64: 1, 16, 1>}, {transform_indices = @transform_6, window_bounds = array<i64: 1, 1, 1, 8>}]} {
    %c0 = arith.constant 0 : index
    %c0_0 = arith.constant 0 : index
    %c0_1 = arith.constant 0 : index
    %0 = vector.load %arg2[%c0, %c0_0, %c0_1] : memref<1x16x32xf32, #tpu.memory_space<vmem>>, vector<1x16x32xf32>
    %1 = vector.shape_cast %0 : vector<1x16x32xf32> to vector<16x32xf32>
    %c0_2 = arith.constant 0 : index
    %c0_3 = arith.constant 0 : index
    %2 = vector.load %arg4[%c0_2, %c0_3] : memref<32x32xf32, #tpu.memory_space<vmem>>, vector<32x32xf32>
    %cst = arith.constant dense<0.000000e+00> : vector<16x32xf32>
    %3 = tpu.matmul %1, %2, %cst {dimension_numbers = #tpu.dot_dimension_numbers<[1], [0], [0], [1], [0, 0, 1, 1], [], []>} : vector<16x32xf32>, vector<32x32xf32>, vector<16x32xf32> -> vector<16x32xf32>
    %c0_4 = arith.constant 0 : index
    %c0_5 = arith.constant 0 : index
    %4 = vector.load %arg5[%c0_4, %c0_5] : memref<1x32xf32, #tpu.memory_space<vmem>>, vector<1x32xf32>
    %5 = vector.broadcast %4 : vector<1x32xf32> to vector<16x32xf32>
    %6 = arith.addf %3, %5 : vector<16x32xf32>
    %c0_6 = arith.constant 0 : index
    %c0_7 = arith.constant 0 : index
    %c0_8 = arith.constant 0 : index
    %7 = vector.load %arg3[%c0_6, %c0_7, %c0_8] : memref<1x8x32xf32, #tpu.memory_space<vmem>>, vector<1x8x32xf32>
    %8 = vector.shape_cast %7 : vector<1x8x32xf32> to vector<8x32xf32>
    %cst_9 = arith.constant dense<0.000000e+00> : vector<16x8xf32>
    %9 = tpu.matmul %6, %8, %cst_9 {dimension_numbers = #tpu.dot_dimension_numbers<[1], [1], [0], [0], [0, 0, 1, 0], [], []>} : vector<16x32xf32>, vector<8x32xf32>, vector<16x8xf32> -> vector<16x8xf32>
    %cst_10 = arith.constant dense<0xFF800000> : vector<16xf32>
    %10 = vector.multi_reduction <maximumf>, %9, %cst_10 [1] : vector<16x8xf32> to vector<16xf32>
    %11 = vector.shape_cast %10 : vector<16xf32> to vector<16x1xf32>
    %12 = vector.broadcast %11 : vector<16x1xf32> to vector<16x8xf32>
    %13 = arith.subf %9, %12 : vector<16x8xf32>
    %14 = math.exp %13 : vector<16x8xf32>
    %cst_11 = arith.constant dense<0.000000e+00> : vector<16xf32>
    %15 = vector.multi_reduction <add>, %14, %cst_11 [1] : vector<16x8xf32> to vector<16xf32>
    %16 = vector.shape_cast %15 : vector<16xf32> to vector<16x1xf32>
    %17 = math.log %16 : vector<16x1xf32>
    %18 = arith.addf %11, %17 : vector<16x1xf32>
    %c0_12 = arith.constant 0 : index
    %c0_13 = arith.constant 0 : index
    %c0_14 = arith.constant 0 : index
    %19 = vector.load %arg7[%c0_12, %c0_13, %c0_14] : memref<1x16x1xf32, #tpu.memory_space<vmem>>, vector<1x16x1xf32>
    %20 = vector.shape_cast %19 : vector<1x16x1xf32> to vector<16x1xf32>
    %21 = vector.shape_cast %18 : vector<16x1xf32> to vector<1x16x1xf32>
    tpu.vector_store %arg7[%c0_12, %c0_13, %c0_14], %21 {strides = array<i32>} : memref<1x16x1xf32, #tpu.memory_space<vmem>>, vector<1x16x1xf32>,
    %cst_15 = arith.constant dense<0xFF800000> : vector<1xf32>
    %22 = vector.multi_reduction <maximumf>, %11, %cst_15 [0] : vector<16x1xf32> to vector<1xf32>
    %23 = vector.shape_cast %22 : vector<1xf32> to vector<1x1xf32>
    %24 = vector.broadcast %23 : vector<1x1xf32> to vector<16x1xf32>
    %25 = arith.subf %11, %24 : vector<16x1xf32>
    %26 = math.exp %25 : vector<16x1xf32>
    %27 = vector.broadcast %26 : vector<16x1xf32> to vector<16x8xf32>
    %28 = arith.mulf %14, %27 : vector<16x8xf32>
    %cst_16 = arith.constant dense<0.000000e+00> : vector<8xf32>
    %29 = vector.multi_reduction <add>, %28, %cst_16 [0] : vector<16x8xf32> to vector<8xf32>
    %30 = vector.shape_cast %29 : vector<8xf32> to vector<1x8xf32>
    %31 = math.log %30 : vector<1x8xf32>
    %32 = vector.broadcast %23 : vector<1x1xf32> to vector<1x8xf32>
    %33 = arith.addf %32, %31 : vector<1x8xf32>
    %c0_17 = arith.constant 0 : index
    %c0_18 = arith.constant 0 : index
    %c0_19 = arith.constant 0 : index
    %c0_20 = arith.constant 0 : index
    %34 = vector.load %arg8[%c0_17, %c0_18, %c0_19, %c0_20] : memref<1x1x1x8xf32, #tpu.memory_space<vmem>>, vector<1x1x1x8xf32>
    %35 = vector.shape_cast %34 : vector<1x1x1x8xf32> to vector<1x8xf32>
    %36 = vector.shape_cast %33 : vector<1x8xf32> to vector<1x1x1x8xf32>
    tpu.vector_store %arg8[%c0_17, %c0_18, %c0_19, %c0_20], %36 {strides = array<i32>} : memref<1x1x1x8xf32, #tpu.memory_space<vmem>>, vector<1x1x1x8xf32>,
    %c0_21 = arith.constant 0 : index
    %c0_22 = arith.constant 0 : index
    %c0_23 = arith.constant 0 : index
    %37 = vector.load %arg6[%c0_21, %c0_22, %c0_23] : memref<1x16x8xf32, #tpu.memory_space<vmem>>, vector<1x16x8xf32>
    %38 = vector.shape_cast %37 : vector<1x16x8xf32> to vector<16x8xf32>
    %39 = vector.shape_cast %9 : vector<16x8xf32> to vector<1x16x8xf32>
    tpu.vector_store %arg6[%c0_21, %c0_22, %c0_23], %39 {strides = array<i32>} : memref<1x16x8xf32, #tpu.memory_space<vmem>>, vector<1x16x8xf32>,
    return
  }
  func.func @transform_0(%arg0: i32, %arg1: i32) -> (i32, i32, i32) {
    %c0_i32 = arith.constant 0 : i32
    %c0_i32_0 = arith.constant 0 : i32
    return %arg0, %arg1, %c0_i32 : i32, i32, i32
  }
  func.func @transform_1(%arg0: i32, %arg1: i32) -> (i32, i32, i32) {
    %c0_i32 = arith.constant 0 : i32
    %c0_i32_0 = arith.constant 0 : i32
    %c0_i32_1 = arith.constant 0 : i32
    return %arg0, %c0_i32, %c0_i32_0 : i32, i32, i32
  }
  func.func @transform_2(%arg0: i32, %arg1: i32) -> (i32, i32) {
    %c0_i32 = arith.constant 0 : i32
    %c0_i32_0 = arith.constant 0 : i32
    %c0_i32_1 = arith.constant 0 : i32
    return %c0_i32, %c0_i32_0 : i32, i32
  }
  func.func @transform_3(%arg0: i32, %arg1: i32) -> (i32, i32) {
    %c0_i32 = arith.constant 0 : i32
    %c0_i32_0 = arith.constant 0 : i32
    %c0_i32_1 = arith.constant 0 : i32
    return %c0_i32, %c0_i32_0 : i32, i32
  }
  func.func @transform_4(%arg0: i32, %arg1: i32) -> (i32, i32, i32) {
    %c0_i32 = arith.constant 0 : i32
    %c0_i32_0 = arith.constant 0 : i32
    return %arg0, %arg1, %c0_i32 : i32, i32, i32
  }
  func.func @transform_5(%arg0: i32, %arg1: i32) -> (i32, i32, i32) {
    %c0_i32 = arith.constant 0 : i32
    %c0_i32_0 = arith.constant 0 : i32
    return %arg0, %arg1, %c0_i32 : i32, i32, i32
  }
  func.func @transform_6(%arg0: i32, %arg1: i32) -> (i32, i32, i32, i32) {
    %c0_i32 = arith.constant 0 : i32
    %c0_i32_0 = arith.constant 0 : i32
    %c0_i32_1 = arith.constant 0 : i32
    return %arg0, %arg1, %c0_i32, %c0_i32_0 : i32, i32, i32, i32
  }
}

module attributes {stable_mosaic.version = 11 : i64} {
  func.func @_assemble_kernel(%arg0: i32, %arg1: i32, %arg2: memref<1x16x8xf32, #tpu.memory_space<vmem>>, %arg3: memref<1x16x1xf32, #tpu.memory_space<vmem>>, %arg4: memref<1x1x8xf32, #tpu.memory_space<vmem>>, %arg5: memref<1x16x1xf32, #tpu.memory_space<vmem>>, %arg6: memref<1x1x8xf32, #tpu.memory_space<vmem>>, %arg7: memref<1x16x136xf32, #tpu.memory_space<vmem>>) attributes {dimension_semantics = [#tpu.dimension_semantics<parallel>, #tpu.dimension_semantics<parallel>], iteration_bounds = array<i64: 2, 1>, scalar_prefetch = 0 : i64, scratch_operands = 0 : i64, tpu.core_type = #tpu.core_type<tc>, window_params = [{transform_indices = @transform_0, window_bounds = array<i64: 1, 16, 8>}, {transform_indices = @transform_1, window_bounds = array<i64: 1, 16, 1>}, {transform_indices = @transform_2, window_bounds = array<i64: 1, 1, 8>}, {transform_indices = @transform_3, window_bounds = array<i64: 1, 16, 1>}, {transform_indices = @transform_4, window_bounds = array<i64: 1, 1, 8>}, {transform_indices = @transform_5, window_bounds = array<i64: 1, 16, 136>}]} {
    %c0 = arith.constant 0 : index
    %c0_0 = arith.constant 0 : index
    %c0_1 = arith.constant 0 : index
    %0 = vector.load %arg2[%c0, %c0_0, %c0_1] : memref<1x16x8xf32, #tpu.memory_space<vmem>>, vector<1x16x8xf32>
    %1 = vector.shape_cast %0 : vector<1x16x8xf32> to vector<16x8xf32>
    %c0_2 = arith.constant 0 : index
    %c0_3 = arith.constant 0 : index
    %c0_4 = arith.constant 0 : index
    %2 = vector.load %arg5[%c0_2, %c0_3, %c0_4] : memref<1x16x1xf32, #tpu.memory_space<vmem>>, vector<1x16x1xf32>
    %3 = vector.shape_cast %2 : vector<1x16x1xf32> to vector<16x1xf32>
    %c0_5 = arith.constant 0 : index
    %c0_6 = arith.constant 0 : index
    %c0_7 = arith.constant 0 : index
    %4 = vector.load %arg6[%c0_5, %c0_6, %c0_7] : memref<1x1x8xf32, #tpu.memory_space<vmem>>, vector<1x1x8xf32>
    %5 = vector.shape_cast %4 : vector<1x1x8xf32> to vector<1x8xf32>
    %cst = arith.constant 0.000000e+00 : f32
    %6 = vector.broadcast %cst : f32 to vector<16x1xf32>
    %7 = arith.subf %6, %3 : vector<16x1xf32>
    %cst_8 = arith.constant 0.000000e+00 : f32
    %8 = vector.broadcast %cst_8 : f32 to vector<16x1xf32>
    %9 = arith.maximumf %8, %7 : vector<16x1xf32>
    %10 = vector.broadcast %cst_8 : f32 to vector<16x1xf32>
    %11 = arith.subf %10, %7 : vector<16x1xf32>
    %12 = arith.cmpf one, %11, %11 : vector<16x1xf32>
    %13 = vector.broadcast %cst_8 : f32 to vector<16x1xf32>
    %14 = arith.addf %13, %7 : vector<16x1xf32>
    %15 = math.absf %11 : vector<16x1xf32>
    %cst_9 = arith.constant 0.000000e+00 : f32
    %16 = vector.broadcast %cst_9 : f32 to vector<16x1xf32>
    %17 = arith.subf %16, %15 : vector<16x1xf32>
    %18 = math.exp %17 : vector<16x1xf32>
    %19 = math.log1p %18 : vector<16x1xf32>
    %20 = arith.addf %9, %19 : vector<16x1xf32>
    %21 = arith.select %12, %14, %20 : vector<16x1xi1>, vector<16x1xf32>
    %cst_10 = arith.constant 0.000000e+00 : f32
    %22 = vector.broadcast %cst_10 : f32 to vector<16x1xf32>
    %23 = arith.subf %22, %21 : vector<16x1xf32>
    %c0_11 = arith.constant 0 : index
    %c0_12 = arith.constant 0 : index
    %c0_13 = arith.constant 0 : index
    %24 = vector.load %arg3[%c0_11, %c0_12, %c0_13] : memref<1x16x1xf32, #tpu.memory_space<vmem>>, vector<1x16x1xf32>
    %25 = vector.shape_cast %24 : vector<1x16x1xf32> to vector<16x1xf32>
    %26 = arith.subf %23, %25 : vector<16x1xf32>
    %cst_14 = arith.constant 0.000000e+00 : f32
    %27 = vector.broadcast %cst_14 : f32 to vector<1x8xf32>
    %28 = arith.subf %27, %5 : vector<1x8xf32>
    %cst_15 = arith.constant 0.000000e+00 : f32
    %29 = vector.broadcast %cst_15 : f32 to vector<1x8xf32>
    %30 = arith.maximumf %29, %28 : vector<1x8xf32>
    %31 = vector.broadcast %cst_15 : f32 to vector<1x8xf32>
    %32 = arith.subf %31, %28 : vector<1x8xf32>
    %33 = arith.cmpf one, %32, %32 : vector<1x8xf32>
    %34 = vector.broadcast %cst_15 : f32 to vector<1x8xf32>
    %35 = arith.addf %34, %28 : vector<1x8xf32>
    %36 = math.absf %32 : vector<1x8xf32>
    %cst_16 = arith.constant 0.000000e+00 : f32
    %37 = vector.broadcast %cst_16 : f32 to vector<1x8xf32>
    %38 = arith.subf %37, %36 : vector<1x8xf32>
    %39 = math.exp %38 : vector<1x8xf32>
    %40 = math.log1p %39 : vector<1x8xf32>
    %41 = arith.addf %30, %40 : vector<1x8xf32>
    %42 = arith.select %33, %35, %41 : vector<1x8xi1>, vector<1x8xf32>
    %cst_17 = arith.constant 0.000000e+00 : f32
    %43 = vector.broadcast %cst_17 : f32 to vector<1x8xf32>
    %44 = arith.subf %43, %42 : vector<1x8xf32>
    %c0_18 = arith.constant 0 : index
    %c0_19 = arith.constant 0 : index
    %c0_20 = arith.constant 0 : index
    %45 = vector.load %arg4[%c0_18, %c0_19, %c0_20] : memref<1x1x8xf32, #tpu.memory_space<vmem>>, vector<1x1x8xf32>
    %46 = vector.shape_cast %45 : vector<1x1x8xf32> to vector<1x8xf32>
    %47 = arith.subf %44, %46 : vector<1x8xf32>
    %cst_21 = arith.constant 2.000000e+00 : f32
    %48 = vector.broadcast %cst_21 : f32 to vector<16x8xf32>
    %49 = arith.mulf %48, %1 : vector<16x8xf32>
    %50 = vector.broadcast %26 : vector<16x1xf32> to vector<16x8xf32>
    %51 = arith.addf %49, %50 : vector<16x8xf32>
    %52 = vector.broadcast %47 : vector<1x8xf32> to vector<16x8xf32>
    %53 = arith.addf %51, %52 : vector<16x8xf32>
    %c0_22 = arith.constant 0 : index
    %c0_23 = arith.constant 0 : index
    %c0_24 = arith.constant 0 : index
    %54 = vector.load %arg7[%c0_22, %c0_23, %c0_24] : memref<1x16x136xf32, #tpu.memory_space<vmem>>, vector<1x16x8xf32>
    %55 = vector.shape_cast %54 : vector<1x16x8xf32> to vector<16x8xf32>
    %56 = vector.shape_cast %53 : vector<16x8xf32> to vector<1x16x8xf32>
    tpu.vector_store %arg7[%c0_22, %c0_23, %c0_24], %56 {strides = array<i32>} : memref<1x16x136xf32, #tpu.memory_space<vmem>>, vector<1x16x8xf32>,
    %cst_25 = arith.constant 0.000000e+00 : f32
    %57 = vector.broadcast %cst_25 : f32 to vector<16x1xf32>
    %58 = arith.subf %57, %3 : vector<16x1xf32>
    %cst_26 = arith.constant 0.000000e+00 : f32
    %59 = vector.broadcast %cst_26 : f32 to vector<16x1xf32>
    %60 = arith.subf %59, %58 : vector<16x1xf32>
    %cst_27 = arith.constant 0.000000e+00 : f32
    %61 = vector.broadcast %cst_27 : f32 to vector<16x1xf32>
    %62 = arith.maximumf %61, %60 : vector<16x1xf32>
    %63 = vector.broadcast %cst_27 : f32 to vector<16x1xf32>
    %64 = arith.subf %63, %60 : vector<16x1xf32>
    %65 = arith.cmpf one, %64, %64 : vector<16x1xf32>
    %66 = vector.broadcast %cst_27 : f32 to vector<16x1xf32>
    %67 = arith.addf %66, %60 : vector<16x1xf32>
    %68 = math.absf %64 : vector<16x1xf32>
    %cst_28 = arith.constant 0.000000e+00 : f32
    %69 = vector.broadcast %cst_28 : f32 to vector<16x1xf32>
    %70 = arith.subf %69, %68 : vector<16x1xf32>
    %71 = math.exp %70 : vector<16x1xf32>
    %72 = math.log1p %71 : vector<16x1xf32>
    %73 = arith.addf %62, %72 : vector<16x1xf32>
    %74 = arith.select %65, %67, %73 : vector<16x1xi1>, vector<16x1xf32>
    %cst_29 = arith.constant 0.000000e+00 : f32
    %75 = vector.broadcast %cst_29 : f32 to vector<16x1xf32>
    %76 = arith.subf %75, %74 : vector<16x1xf32>
    %77 = vector.shape_cast %76 : vector<16x1xf32> to vector<16x1xf32>
    %78 = vector.broadcast %77 : vector<16x1xf32> to vector<16x128xf32>
    %c0_30 = arith.constant 0 : index
    %c0_31 = arith.constant 0 : index
    %c8 = arith.constant 8 : index
    %79 = vector.load %arg7[%c0_30, %c0_31, %c8] : memref<1x16x136xf32, #tpu.memory_space<vmem>>, vector<1x16x128xf32>
    %80 = vector.shape_cast %79 : vector<1x16x128xf32> to vector<16x128xf32>
    %81 = vector.shape_cast %78 : vector<16x128xf32> to vector<1x16x128xf32>
    tpu.vector_store %arg7[%c0_30, %c0_31, %c8], %81 {strides = array<i32>} : memref<1x16x136xf32, #tpu.memory_space<vmem>>, vector<1x16x128xf32>,
    return
  }
  func.func @transform_0(%arg0: i32, %arg1: i32) -> (i32, i32, i32) {
    %c0_i32 = arith.constant 0 : i32
    %c0_i32_0 = arith.constant 0 : i32
    return %arg0, %arg1, %c0_i32 : i32, i32, i32
  }
  func.func @transform_1(%arg0: i32, %arg1: i32) -> (i32, i32, i32) {
    %c0_i32 = arith.constant 0 : i32
    %c0_i32_0 = arith.constant 0 : i32
    return %arg0, %arg1, %c0_i32 : i32, i32, i32
  }
  func.func @transform_2(%arg0: i32, %arg1: i32) -> (i32, i32, i32) {
    %c0_i32 = arith.constant 0 : i32
    %c0_i32_0 = arith.constant 0 : i32
    %c0_i32_1 = arith.constant 0 : i32
    return %arg0, %c0_i32, %c0_i32_0 : i32, i32, i32
  }
  func.func @transform_3(%arg0: i32, %arg1: i32) -> (i32, i32, i32) {
    %c0_i32 = arith.constant 0 : i32
    %c0_i32_0 = arith.constant 0 : i32
    return %arg0, %arg1, %c0_i32 : i32, i32, i32
  }
  func.func @transform_4(%arg0: i32, %arg1: i32) -> (i32, i32, i32) {
    %c0_i32 = arith.constant 0 : i32
    %c0_i32_0 = arith.constant 0 : i32
    %c0_i32_1 = arith.constant 0 : i32
    return %arg0, %c0_i32, %c0_i32_0 : i32, i32, i32
  }
  func.func @transform_5(%arg0: i32, %arg1: i32) -> (i32, i32, i32) {
    %c0_i32 = arith.constant 0 : i32
    %c0_i32_0 = arith.constant 0 : i32
    return %arg0, %arg1, %c0_i32 : i32, i32, i32
  }
}

</mosaic_0001>

<bundles_post_ra>
// kernel: match_assignment.3
= control target key start
LH: loop header
LB: loop body
LE: loop exit
PB: predicated region body
PF: predicated region fallthrough
CT: control target
= control target key end

     0   :  { %s788_s18 = smov 0   ;;  %s790_s19 = smov 0   ;;  %s904_s0 = inlined_call_operand.vmem [shape: f32[2,16,8], index: 0, kind: input, shape index: {}]   ;;  %s905_s1 = inlined_call_operand.vmem [shape: f32[2,16,1], index: 1, kind: input, shape index: {}]   ;;  %s906_s2 = inlined_call_operand.vmem [shape: f32[2,1,8], index: 2, kind: input, shape index: {}]   ;;  %s907_s3 = inlined_call_operand.vmem [shape: f32[2,16,1], index: 3, kind: input, shape index: {}]   ;;  %s908_s4 = inlined_call_operand.vmem [shape: f32[2,1,8], index: 4, kind: input, shape index: {}]   ;;  %s909_s5 = inlined_call_operand.vmem [shape: f32[2,16,136], index: 5, kind: output, shape index: {}]  }
   0x1   :  { %s792_s20 = smov 0  }
   0x2 LB: > { %s27_s21 = sadd.s32 1, %s751_s19  ;;  %p671_p0 = scmp.ge.s32.totalorder %s755_s20, 1  ;;  %s755_s20 = sphi %s792_s20, %s15_s20   ;;  %s751_s19 = sphi %s790_s19, %s917_s19   ;;  %s747_s18 = sphi %s788_s18, %s916_s18  }
   0x3   : > { %p29_p1 = scmp.ge.s32.totalorder %s27_s21, 2  ;;  %p258_p2 = scmp.lt.s32.totalorder %s755_s20, 3 }
   0x5   : > { %s919_s21 = smov (%p29_p1, %s27_s21), 0  ;;  %p259_p3 = pnand %p671_p0, %p258_p2 }
   0x6   : > { %p320_p4 = scmp.lt.s32.totalorder (!%p259_p3), %s747_s18, 1  ;;  %v757_v0 = vmov (!%p259_p3), 0   ;;  %vm462_vm10 = vcmask (!%p259_p3), 64512   ;;  %vm515_vm11 = vcmask (!%p259_p3), 1047616  }
   0x7   : > { %262 = sbr.rel (%p259_p3) target bundleno = 200 (0xc8), region = 40  ;;  %711 = vset.pattern.permute.xlu0 (!%p259_p3), %v757_v0  ;;  %712 = vset.pattern.permute.xlu1 (!%p259_p3), %v757_v0 }
   0xe   : > { %s921_s18 = smov (!%p320_p4, %s747_s18), 1 }
   0xf   : > { %s809_s22 = sshll.u32 %s921_s18, 4  ;;  %s354_s6 = scalar_lea.vmem %s908_s4, %s921_s18 }
  0x10   : > { %s350_s25 = scalar_lea.vmem %s907_s3, %s809_s22  ;;  %s337_s28 = scalar_lea.vmem %s905_s1, %s809_s22 }
  0x11   : > { %v368_v1 = vld [vmem:[%s350_s25] sm:$0xff]  ;;  %v369_v2 = vld [vmem:[%s350_s25 + $0x8] sm:$0xff]  ;;  %s341_s9 = scalar_lea.vmem %s906_s2, %s921_s18  ;;  %s327_s12 = scalar_lea.vmem %s904_s0, %s809_s22 }
  0x12   : > { %v815_v3 = vsub.f32 0.0, %v368_v1  ;;  %v817_v4 = vsub.f32 0.0, %v369_v2  ;;  %v413_v1 = vld [vmem:[%s337_s28] sm:$0xff]  ;;  %s685_s13 = sshll.u32 %s921_s18, 5 }
  0x13   : > { %s364_s16 = scalar_lea.vmem %s909_s5, %s685_s13 }
  0x14   : > { %v820_v5 = vsub.f32 0.0, %v815_v3  ;;  %v823_v6 = vsub.f32 0.0, %v817_v4  ;;  %v373_v42 = vmax.f32 %v815_v3, 0.0  ;;  %v374_v48 = vmax.f32 %v817_v4, 0.0 }
  0x16   : > { %v381_v7 = vand.u32 2147483647, %v820_v5  ;;  %v382_v8 = vand.u32 2147483647, %v823_v6  ;;  %v828_v9 = vsub.f32 0.0, %v820_v5  ;;  %v831_v10 = vsub.f32 0.0, %v823_v6 }
  0x17   : > { %vm377_vm1 = vcmp.ne.f32.partialorder %v820_v5, %v820_v5  ;;  %v465_v50 = vmax.f32 %v820_v5, 0.0  ;;  %vm378_vm3 = vcmp.ne.f32.partialorder %v823_v6, %v823_v6  ;;  %v466_v56 = vmax.f32 %v823_v6, 0.0 }
  0x18   : > { %v383_v11 = vsub.f32 0.0, %v381_v7  ;;  %v384_v12 = vsub.f32 0.0, %v382_v8  ;;  %v473_v13 = vand.u32 2147483647, %v828_v9  ;;  %v474_v14 = vand.u32 2147483647, %v831_v10 }
  0x19   : > { %vm469_vm6 = vcmp.ne.f32.partialorder %v828_v9, %v828_v9  ;;  %vm470_vm7 = vcmp.ne.f32.partialorder %v831_v10, %v831_v10 }
  0x1a   : > { %v385_v15 = vmul.f32 1.442695, %v383_v11  ;;  %v387_v16 = vmul.f32 1.442695, %v384_v12  ;;  %v475_v17 = vsub.f32 0.0, %v473_v13  ;;  %v476_v18 = vsub.f32 0.0, %v474_v14 }
  0x1c   : > { %713 = vpow2.f32 %v385_v15  ;;  %v477_v19 = vmul.f32 1.442695, %v475_v17  ;;  %v479_v20 = vmul.f32 1.442695, %v476_v18 }
  0x1d   : > { %715 = vpow2.f32 %v387_v16 }
  0x1e   : > { %717 = vpow2.f32 %v477_v19 }
  0x1f   : > { %719 = vpow2.f32 %v479_v20 }
  0x26   : > { %v714_v21 = vpop.eup %713 }
  0x27   : > { %v716_v22 = vpop.eup %715  ;;  %v389_v23 = vadd.f32 1.0, %v714_v21  ;;  %v392_v27 = vmul.f32 -0.5, %v714_v21  ;;  %v395_v34 = vand.u32 2147483647, %v714_v21 }
  0x28   : > { %v398_v24 = vadd.f32 1.0, %v716_v22  ;;  %v718_v25 = vpop.eup %717  ;;  %v401_v29 = vmul.f32 -0.5, %v716_v22  ;;  %v404_v36 = vand.u32 2147483647, %v716_v22 }
  0x29   : > { %721 = vlog2.f32 %v389_v23  ;;  %v720_v26 = vpop.eup %719  ;;  %v481_v28 = vadd.f32 1.0, %v718_v25  ;;  %v484_v31 = vmul.f32 -0.5, %v718_v25  ;;  %v393_v32 = vadd.f32 1.0, %v392_v27 }
  0x2a   : > { %723 = vlog2.f32 %v398_v24  ;;  %v490_v30 = vadd.f32 1.0, %v720_v26  ;;  %v493_v33 = vmul.f32 -0.5, %v720_v26  ;;  %v402_v35 = vadd.f32 1.0, %v401_v29 }
  0x2b   : > { %725 = vlog2.f32 %v481_v28  ;;  %v485_v37 = vadd.f32 1.0, %v484_v31  ;;  %v394_v38 = vmul.f32 %v714_v21, %v393_v32  ;;  %v487_v39 = vand.u32 2147483647, %v718_v25 }
  0x2c   : > { %727 = vlog2.f32 %v490_v30  ;;  %v494_v40 = vadd.f32 1.0, %v493_v33  ;;  %vm836_vm0 = vcmp.lt.f32.partialorder %v395_v34, 0.0004427343  ;;  %v403_v44 = vmul.f32 %v716_v22, %v402_v35 }
  0x2d   : > { %v496_v45 = vand.u32 2147483647, %v720_v26  ;;  %vm843_vm2 = vcmp.lt.f32.partialorder %v404_v36, 0.0004427343  ;;  %v486_v51 = vmul.f32 %v718_v25, %v485_v37  ;;  %vm856_vm4 = vcmp.lt.f32.partialorder %v487_v39, 0.0004427343 }
  0x2e   : > { %v495_v57 = vmul.f32 %v720_v26, %v494_v40  ;;  %v455_v33 = vlaneseq  ;;  %v438_v37 = vld [vmem:[%s341_s9] sm:$0x1] }
  0x2f   : > { %vm497_vm5 = vcmp.lt.f32.partialorder %v496_v45, 0.0004427343 }
  0x30   : > { %v456_v36 = vshrl.u32 %v455_v33, 7 }
  0x32   : > { %v457_v40 = vsub.s32 0, %v456_v36 }
  0x33   : > { %v722_v41 = vpop.eup %721 }
  0x34   : > { %v724_v46 = vpop.eup %723  ;;  %v391_v47 = vmul.f32 0.6931472, %v722_v41 }
  0x35   : > { %v400_v52 = vmul.f32 0.6931472, %v724_v46  ;;  %v726_v53 = vpop.eup %725 }
  0x36   : > { %v397_v54 = vsel %vm836_vm0, %v394_v38, %v391_v47  ;;  %v728_v58 = vpop.eup %727  ;;  %v483_v60 = vmul.f32 0.6931472, %v726_v53  ;;  %v366_v38 = vld [vmem:[%s327_s12] sm:$0xff] }
  0x37   : > { %v407_v59 = vadd.f32 %v397_v54, %v373_v42  ;;  %v406_v61 = vsel %vm843_vm2, %v403_v44, %v400_v52  ;;  %v492_v63 = vmul.f32 0.6931472, %v728_v58  ;;  %v440_v41 = vmul.f32 2.0, %v366_v38  ;;  %v367_v42 = vld [vmem:[%s327_s12 + $0x8] sm:$0xff] }
  0x38   : > { %v408_v62 = vadd.f32 %v406_v61, %v374_v48  ;;  %v489_v2 = vsel %vm856_vm4, %v486_v51, %v483_v60  ;;  %v441_v47 = vmul.f32 2.0, %v367_v42 }
  0x39   : > { %v409_v0 = vsel %vm377_vm1, %v815_v3, %v407_v59  ;;  %v499_v8 = vadd.f32 %v489_v2, %v465_v50  ;;  %v498_v12 = vsel %vm497_vm5, %v495_v57, %v492_v63  ;;  %v414_v3 = vld [vmem:[%s337_s28 + $0x8] sm:$0xff] }
  0x3a   : > { %v411_v7 = vsub.f32 0.0, %v409_v0  ;;  %v410_v11 = vsel %vm378_vm3, %v817_v4, %v408_v62  ;;  %v500_v14 = vadd.f32 %v498_v12, %v466_v56  ;;  %v370_v4 = vld [vmem:[%s354_s6] sm:$0x1] }
  0x3b   : > { %v412_v13 = vsub.f32 0.0, %v410_v11  ;;  %v501_v9 = vsel %vm469_vm6, %v820_v5, %v499_v8  ;;  %v417_v19 = vsub.f32 0.0, %v370_v4 }
  0x3c   : > { %v415_v15 = vsub.f32 %v411_v7, %v413_v1  ;;  %v503_v16 = vsub.f32 0.0, %v501_v9  ;;  %v502_v17 = vsel %vm470_vm7, %v823_v6, %v500_v14 }
  0x3d   : > { %v416_v10 = vsub.f32 %v412_v13, %v414_v3  ;;  %v504_v18 = vsub.f32 0.0, %v502_v17  ;;  %v419_v20 = vsub.f32 0.0, %v417_v19  ;;  %v418_v30 = vmax.f32 %v417_v19, 0.0 }
  0x3e   : > { %444 = vperm.xlu0 %711, %v415_v15   ;;  %507 = vperm.xlu1 %712, %v503_v16  }
  0x3f   : > { %v422_v21 = vand.u32 2147483647, %v419_v20  ;;  %vm420_vm9 = vcmp.ne.f32.partialorder %v419_v20, %v419_v20 }
  0x41   : > { %v423_v22 = vsub.f32 0.0, %v422_v21 }
  0x42   : > { %449 = vperm.xlu0 %711, %v416_v10   ;;  %512 = vperm.xlu1 %712, %v504_v18  }
  0x43   : > { %v424_v23 = vmul.f32 1.442695, %v423_v22 }
  0x45   : > { %729 = vpow2.f32 %v424_v23 }
  0x4f   : > { %v730_v5 = vpop.eup %729 }
  0x50   : > { %v426_v6 = vadd.f32 1.0, %v730_v5  ;;  %v429_v24 = vmul.f32 -0.5, %v730_v5  ;;  %v432_v27 = vand.u32 2147483647, %v730_v5 }
  0x52   : > { %731 = vlog2.f32 %v426_v6  ;;  %v430_v25 = vadd.f32 1.0, %v429_v24  ;;  %vm433_vm8 = vcmp.lt.f32.partialorder %v432_v27, 0.0004427343 }
  0x54   : > { %v431_v29 = vmul.f32 %v730_v5, %v430_v25 }
  0x5c   : > { %v732_v26 = vpop.eup %731 }
  0x5d   : > { %v428_v28 = vmul.f32 0.6931472, %v732_v26 }
  0x5f   : > { %v434_v31 = vsel %vm433_vm8, %v431_v29, %v428_v28 }
  0x60   : > { %v435_v32 = vadd.f32 %v434_v31, %v418_v30 }
  0x62   : > { %v436_v34 = vsel %vm420_vm9, %v417_v19, %v435_v32 }
  0x63   : > { %v437_v35 = vsub.f32 0.0, %v436_v34 }
  0x65   : > { %v439_v39 = vsub.f32 %v437_v35, %v438_v37 }
  0x67   : > { %v458_v43 = vrot.slane %v439_v39, %v457_v40 }
  0xbd   : > { %v445_v44 = vpop.permute.xlu0 %444  ;;  %v508_v46 = vpop.permute.xlu1 %507 }
  0xbe   : > { %v452_v45 = vadd.f32 %v445_v44, %v440_v41  ;;  %517 = vst.msk [vmem:[%s364_s16 + $0x8] sm:$0xff] %vm462_vm10, %v508_v46 }
  0xc0   : > { %v460_v48 = vadd.f32 %v458_v43, %v452_v45 }
  0xc1   : > { %v450_v49 = vpop.permute.xlu0 %449  ;;  %v513_v51 = vpop.permute.xlu1 %512 }
  0xc2   : > { %463 = vst.msk [vmem:[%s364_s16] sm:$0xff] %vm462_vm10, %v460_v48  ;;  %v453_v50 = vadd.f32 %v450_v49, %v441_v47  ;;  %519 = vst.msk [vmem:[%s364_s16 + $0x18] sm:$0xff] %vm462_vm10, %v513_v51 }
  0xc3   : > { %516 = vst.msk [vmem:[%s364_s16] sm:$0xff] %vm515_vm11, %v508_v46 }
  0xc4   : > { %v461_v52 = vadd.f32 %v458_v43, %v453_v50 }
  0xc6   : > { %464 = vst.msk [vmem:[%s364_s16 + $0x10] sm:$0xff] %vm462_vm10, %v461_v52 }
  0xc7   : > { %518 = vst.msk [vmem:[%s364_s16 + $0x10] sm:$0xff] %vm515_vm11, %v513_v51 }
  0xc8 PF: > { %s15_s20 = sadd.s32 1, %s755_s20   ;;  %s916_s18 = smov %s751_s19 }
  0xc9   : > { %p12_p5 = scmp.ge.s32.totalorder %s15_s20, 4   ;;  %s917_s19 = smov %s919_s21 }
  0xcb   :  { %14 = sbr.rel (!%p12_p5) target bundleno = 2 (0x2), region = 82 }

// kernel: match_assignment.2
= control target key start
LH: loop header
LB: loop body
LE: loop exit
PB: predicated region body
PF: predicated region fallthrough
CT: control target
= control target key end

     0   :  { %s924_s21 = smov 0   ;;  %s926_s22 = smov 0   ;;  %s1005_s0 = inlined_call_operand.vmem [shape: f32[2,16,32], index: 0, kind: input, shape index: {}]   ;;  %s1006_s1 = inlined_call_operand.vmem [shape: f32[2,8,32], index: 1, kind: input, shape index: {}]   ;;  %s1007_s2 = inlined_call_operand.vmem [shape: f32[32,32], index: 2, kind: input, shape index: {}]   ;;  %s1008_s3 = inlined_call_operand.vmem [shape: f32[1,32], index: 3, kind: input, shape index: {}]   ;;  %s1009_s4 = inlined_call_operand.vmem [shape: f32[2,16,8], index: 4, kind: output, shape index: {0}]   ;;  %s1010_s5 = inlined_call_operand.vmem [shape: f32[2,16,1], index: 5, kind: output, shape index: {1}]   ;;  %s1011_s6 = inlined_call_operand.vmem [shape: f32[2,1,1,8], index: 6, kind: output, shape index: {2}]  }
   0x1   :  { %s928_s23 = smov 0  }
   0x2 LB: > { %s29_s24 = sadd.s32 1, %s883_s22  ;;  %p775_p0 = scmp.ge.s32.totalorder %s887_s23, 1  ;;  %s887_s23 = sphi %s928_s23, %s17_s23   ;;  %s883_s22 = sphi %s926_s22, %s1013_s22   ;;  %s879_s21 = sphi %s924_s21, %s1012_s21  }
   0x3   : > { %p31_p1 = scmp.ge.s32.totalorder %s29_s24, 2  ;;  %p251_p2 = scmp.lt.s32.totalorder %s887_s23, 3 }
   0x5   : > { %s1015_s24 = smov (%p31_p1, %s29_s24), 0  ;;  %p252_p3 = pnand %p775_p0, %p251_p2 }
   0x6   : > { %v350_v0 = vld [vmem:[%s1007_s2] sm:$0xff] (!%p252_p3)  ;;  %v351_v1 = vld [vmem:[%s1007_s2 + $0x8] sm:$0xff] (!%p252_p3)  ;;  %v352_v2 = vld [vmem:[%s1007_s2 + $0x10] sm:$0xff] (!%p252_p3)  ;;  %p309_p4 = scmp.lt.s32.totalorder (!%p252_p3), %s879_s21, 1  ;;  %vm361_vm0 = vcmask (!%p252_p3), 261120   ;;  %vm528_vm1 = vcmask (!%p252_p3), 64512  }
   0x7   : > { %255 = sbr.rel (%p252_p3) target bundleno = 769 (0x301), region = 36  ;;  %v819_v3 = vpack.c.bf16 (!%p252_p3), %v351_v1, %v350_v0  ;;  %v353_v4 = vld [vmem:[%s1007_s2 + $0x18] sm:$0xff] (!%p252_p3)  ;;  %v783_v9 = vld [vmem:[%s1008_s3] ss:$0 sm:$0xff] (!%p252_p3)  ;;  %vm583_vm2 = vcmask (!%p252_p3), 57344   ;;  %vm553_vm3 = vcmask (!%p252_p3), 7168  }
   0x8   : > { %v823_v5 = vpack.c.bf16 (!%p252_p3), %v353_v4, %v352_v2 }
   0x9   : > { %820 = vmatprep.subr.bf16.mxu0 (!%p252_p3), %v819_v3 }
   0xa   : > { %822 = vmatpush3.bf16.msra.mxu0 (!%p252_p3), %v819_v3 }
   0xb   : > { %824 = vmatprep.subr.bf16.mxu0 (!%p252_p3), %v823_v5 }
   0xe   : > { %s1017_s21 = smov (!%p309_p4, %s879_s21), 1  ;;  %826 = vmatpush3.bf16.msra.mxu0 %v823_v5 }
   0xf   : > { %s957_s9 = sshll.u32 %s1017_s21, 4  ;;  %s778_s13 = sshll.u32 %s1017_s21, 3 }
  0x10   : > { %s316_s12 = scalar_lea.vmem %s1005_s0, %s957_s9  ;;  %s321_s16 = scalar_lea.vmem %s1006_s1, %s778_s13 }
  0x11   : > { %v348_v6 = vld [vmem:[%s316_s12] sm:$0xff]  ;;  %v349_v7 = vld [vmem:[%s316_s12 + $0x8] sm:$0xff]  ;;  %s330_s25 = scalar_lea.vmem %s1009_s4, %s957_s9  ;;  %s347_s28 = scalar_lea.vmem %s1011_s6, %s1017_s21 }
  0x12   : > { %811 = vmatprep.mubr.msk.f32.mxu0 %vm361_vm0, %v348_v6  ;;  %v443_v8 = vld [vmem:[%s321_s16] sm:$0xff]  ;;  %s340_s7 = scalar_lea.vmem %s1010_s5, %s957_s9 }
  0x13   : > { %812 = vmatmul.mubr.msk.f32.vlgmr.msra.gmra.mrb[0].mxu0 %vm361_vm0, %v349_v7  ;;  %814 = vmatprep.subr.msk.mxu1 %vm361_vm0, %v443_v8 }
  0x14   : > { %815 = vmatpush3.xpose.msk.msra.mxu1 %vm361_vm0, %v443_v8 }
  0xe6   : > { %v813_v10 = vpop.f32.mrb[0].mxu0 }
  0xe7   : > { %v434_v11 = vpop.f32.mrb[1].mxu0  ;;  %v440_v13 = vadd.f32 %v813_v10, %v783_v9 }
  0xe8   : > { %v435_v12 = vadd.f32 %v783_v9, %v434_v11 }
  0xea   : > { %816 = vmatprep.mubr.msk.f32.mxu1 %vm361_vm0, %v435_v12 }
  0xeb   : > { %817 = vmatmul.mubr.msk.f32.vlgmr.msra.gmra.mrb[0].mxu1 %vm361_vm0, %v440_v13 }
 0x1be   : > { %v818_v14 = vpop.f32.mrb[0].mxu1 }
 0x1bf   : > { %586 = vst.msk [vmem:[%s330_s25 + $0x8] sm:$0xff] %vm528_vm1, %v818_v14  ;;  %v519_v15 = vpop.f32.mrb[1].mxu1  ;;  %v532_v17 = vsel %vm528_vm1, %v818_v14, -inf }
 0x1c0   : > { %585 = vst.msk [vmem:[%s330_s25] sm:$0xff] %vm528_vm1, %v519_v15  ;;  %v529_v16 = vsel %vm528_vm1, %v519_v15, -inf }
 0x1c1   : > { %530 = vmax.xlane.f32.xlu0 %v529_v16 }
 0x1c5   : > { %533 = vmax.xlane.f32.xlu0 %v532_v17 }
 0x24e   : > { %v531_v18 = vpop.xlane.xlu0 %530 }
 0x24f   : > { %v535_v19 = vsub.f32 %v519_v15, %v531_v18 }
 0x251   : > { %v537_v20 = vmul.f32 1.442695, %v535_v19 }
 0x252   : > { %v534_v21 = vpop.xlane.xlu0 %533 }
 0x253   : > { %851 = vpow2.f32 %v537_v20  ;;  %v536_v22 = vsub.f32 %v818_v14, %v534_v21  ;;  %v556_v23 = vmax.f32 %v531_v18, %v534_v21 }
 0x255   : > { %v539_v24 = vmul.f32 1.442695, %v536_v22  ;;  %v557_v25 = vrot.slane %v556_v23, 4 }
 0x257   : > { %853 = vpow2.f32 %v539_v24  ;;  %v558_v26 = vmax.f32 %v556_v23, %v557_v25 }
 0x259   : > { %v559_v27 = vrot.slane %v558_v26, 2 }
 0x25b   : > { %v560_v28 = vmax.f32 %v558_v26, %v559_v27 }
 0x25d   : > { %v852_v29 = vpop.eup %851  ;;  %v561_v30 = vrot.slane %v560_v28, 1 }
 0x25e   : > { %v541_v31 = vsel %vm528_vm1, %v852_v29, 0.0 }
 0x25f   : > { %v562_v32 = vmax.f32 %v560_v28, %v561_v30  ;;  %542 = vadd.xlane.f32.xlu1 %v541_v31 }
 0x261   : > { %v854_v33 = vpop.eup %853  ;;  %v563_v34 = vsub.f32 %v531_v18, %v562_v32  ;;  %v564_v35 = vsub.f32 %v534_v21, %v562_v32 }
 0x262   : > { %v544_v36 = vsel %vm528_vm1, %v854_v33, 0.0 }
 0x263   : > { %v565_v37 = vmul.f32 1.442695, %v563_v34  ;;  %v567_v38 = vmul.f32 1.442695, %v564_v35  ;;  %545 = vadd.xlane.f32.xlu1 %v544_v36 }
 0x265   : > { %855 = vpow2.f32 %v565_v37 }
 0x266   : > { %857 = vpow2.f32 %v567_v38 }
 0x26f   : > { %v856_v39 = vpop.eup %855 }
 0x270   : > { %v858_v40 = vpop.eup %857  ;;  %v569_v41 = vmul.f32 %v856_v39, %v852_v29 }
 0x271   : > { %v570_v42 = vmul.f32 %v858_v40, %v854_v33 }
 0x272   : > { %v571_v43 = vsel %vm528_vm1, %v569_v41, 0.0 }
 0x273   : > { %v572_v44 = vsel %vm528_vm1, %v570_v42, 0.0 }
 0x274   : > { %v573_v45 = vadd.f32 %v572_v44, %v571_v43 }
 0x276   : > { %v574_v46 = vrot.slane %v573_v45, 4 }
 0x278   : > { %v575_v47 = vadd.f32 %v574_v46, %v573_v45 }
 0x27a   : > { %v576_v48 = vrot.slane %v575_v47, 2 }
 0x27c   : > { %v577_v49 = vadd.f32 %v576_v48, %v575_v47 }
 0x27e   : > { %v578_v50 = vrot.slane %v577_v49, 1 }
 0x280   : > { %v579_v51 = vadd.f32 %v578_v50, %v577_v49 }
 0x282   : > { %859 = vlog2.f32 %v579_v51 }
 0x28c   : > { %v860_v52 = vpop.eup %859 }
 0x28d   : > { %v581_v53 = vmul.f32 0.6931472, %v860_v52 }
 0x28f   : > { %v582_v54 = vadd.f32 %v581_v53, %v562_v32 }
 0x291   : > { %584 = vst.msk [vmem:[%s347_s28] sm:$0x1] %vm583_vm2, %v582_v54 }
 0x2ec   : > { %v543_v55 = vpop.xlane.xlu1 %542 }
 0x2ed   : > { %861 = vlog2.f32 %v543_v55 }
 0x2f0   : > { %v546_v56 = vpop.xlane.xlu1 %545 }
 0x2f1   : > { %863 = vlog2.f32 %v546_v56 }
 0x2f7   : > { %v862_v57 = vpop.eup %861 }
 0x2f8   : > { %v548_v58 = vmul.f32 0.6931472, %v862_v57 }
 0x2fa   : > { %v551_v59 = vadd.f32 %v548_v58, %v531_v18 }
 0x2fb   : > { %v864_v60 = vpop.eup %863 }
 0x2fc   : > { %554 = vst.msk [vmem:[%s340_s7] sm:$0xff] %vm553_vm3, %v551_v59  ;;  %v550_v61 = vmul.f32 0.6931472, %v864_v60 }
 0x2fe   : > { %v552_v62 = vadd.f32 %v550_v61, %v534_v21 }
 0x300   : > { %555 = vst.msk [vmem:[%s340_s7 + $0x8] sm:$0xff] %vm553_vm3, %v552_v62 }
 0x301 PF: > { %s17_s23 = sadd.s32 1, %s887_s23   ;;  %s1012_s21 = smov %s883_s22 }
 0x302   : > { %p14_p5 = scmp.ge.s32.totalorder %s17_s23, 4   ;;  %s1013_s22 = smov %s1015_s24 }
 0x304   :  { %16 = sbr.rel (!%p14_p5) target bundleno = 2 (0x2), region = 93 }

</bundles_post_ra>
